<compile_context>
chip_gen: v6e
topology: v6e:2x2x1
jax: 0.10.0
libtpu: 0.0.40
codegen_flags: <defaults>
</compile_context>

<pallas_src>
import functools

import jax
import jax.numpy as jnp
from jax.experimental import pallas as pl
from jax.experimental.pallas import tpu as pltpu

NUM_EMBED = 20000
EMBED_DIM = 8               # embedding_dim
NUM_FEATURES = 14           # len(features_col)
SEQ_LEN = 6                 # synthetic sequence length per feature column
IN_DIM = EMBED_DIM * NUM_FEATURES   # 112
HIDDEN1, HIDDEN2, OUT = 512, 128, 1


def din_mlp_kernel(x_ref, w1_ref, b1_ref, w2_ref, b2_ref, w3_ref, b3_ref, o_ref):
    # x_ref: [TB, 112] bf16 pooled activation tile (K=112, masked by Mosaic).
    h1 = jnp.dot(x_ref[...], w1_ref[...], preferred_element_type=jnp.float32)
    h1 = jnp.maximum(h1 + b1_ref[...], 0.0)                                 # [TB, 512] f32
    h2 = jnp.dot(h1.astype(jnp.bfloat16), w2_ref[...],
                 preferred_element_type=jnp.float32)
    h2 = jnp.maximum(h2 + b2_ref[...], 0.0)                                 # [TB, 128] f32
    # fc3 has a single output column: VPU multiply + lane reduce instead of an
    # N=1 MXU pass.
    o_ref[...] = jnp.sum(h2 * w3_ref[...], axis=-1, keepdims=True) + b3_ref[...]


def _round_up(n, m):
    return ((n + m - 1) // m) * m


def _choose_batch_tile(B, batch_tile):
    Bp8 = _round_up(B, 8)
    tb = min(batch_tile, Bp8)
    # Keep >= 2 grid steps when the batch allows so the "parallel" batch axis
    # can shard across both v7x TensorCores (harmless on single-TC v5e/v6e).
    if Bp8 >= 16:
        tb = min(tb, _round_up((Bp8 + 1) // 2, 8))
    return tb


@functools.partial(jax.jit, static_argnames=("batch_tile",))
def my_model_forward(feature_ids, emb_table, w1, b1, w2, b2, w3, b3, *, batch_tile=512):
    """feature_ids: [B, F, L] int32 ids. Returns [B, 1] float32 logits."""
    B, F, L = feature_ids.shape
    del L

    # ---- XLA glue: embedding gather (bf16 rows -> half the gather HBM bytes)
    # + per-feature sequence sum-pool with f32 accumulation, one fusion.
    # TODO(synk): embedding gather (padding_idx=0: table row 0 is zero) has no
    #             clean Pallas equivalent here; it stays on the XLA side.
    rows = jnp.take(emb_table.astype(jnp.bfloat16), feature_ids, axis=0)   # [B,F,L,E] bf16
    pooled = jnp.sum(rows.astype(jnp.float32), axis=2)                     # [B,F,E] f32
    x = pooled.reshape(B, F * EMBED_DIM)                                   # [B, 112]

    tb = _choose_batch_tile(B, batch_tile)
    Bp = _round_up(B, tb)
    x_bf = jnp.pad(x, ((0, Bp - B), (0, 0))).astype(jnp.bfloat16)          # [Bp, 112]

    # bf16 weights (f32 accumulation happens inside the kernel).
    w1_bf = w1.astype(jnp.bfloat16)                                        # [112, 512]
    w2_bf = w2.astype(jnp.bfloat16)                                        # [512, 128]
    w3_row = w3.reshape(1, HIDDEN2).astype(jnp.float32)                    # [1, 128]

    out = pl.pallas_call(
        din_mlp_kernel,
        out_shape=jax.ShapeDtypeStruct((Bp, OUT), jnp.float32),
        grid=(Bp // tb,),
        in_specs=[
            pl.BlockSpec((tb, IN_DIM), lambda i: (i, 0)),          # activation tile
            pl.BlockSpec((IN_DIM, HIDDEN1), lambda i: (0, 0)),     # w1 (VMEM-resident)
            pl.BlockSpec((1, HIDDEN1), lambda i: (0, 0)),          # b1
            pl.BlockSpec((HIDDEN1, HIDDEN2), lambda i: (0, 0)),    # w2 (VMEM-resident)
            pl.BlockSpec((1, HIDDEN2), lambda i: (0, 0)),          # b2
            pl.BlockSpec((1, HIDDEN2), lambda i: (0, 0)),          # w3 as row vector
            pl.BlockSpec((1, OUT), lambda i: (0, 0)),              # b3
        ],
        out_specs=pl.BlockSpec((tb, OUT), lambda i: (i, 0)),
        compiler_params=pltpu.CompilerParams(
            dimension_semantics=("parallel",),
        ),
    )(x_bf, w1_bf, b1, w2_bf, b2, w3_row, b3)
    return out[:B]


def _reference(feature_ids, emb_table, w1, b1, w2, b2, w3, b3, *, bf16=True):
    """Pure-JAX reference; bf16=True mirrors the kernel's casts exactly."""
    hi = jax.lax.Precision.HIGHEST
    B = feature_ids.shape[0]
    if bf16:
        rows = jnp.take(emb_table.astype(jnp.bfloat16), feature_ids, axis=0)
        rows = rows.astype(jnp.float32)
    else:
        rows = jnp.take(emb_table, feature_ids, axis=0)
    pooled = jnp.sum(rows, axis=2).reshape(B, IN_DIM)
    if bf16:
        xb = pooled.astype(jnp.bfloat16).astype(jnp.float32)
        w1f = w1.astype(jnp.bfloat16).astype(jnp.float32)
        w2f = w2.astype(jnp.bfloat16).astype(jnp.float32)
    else:
        xb, w1f, w2f = pooled, w1, w2
    h1 = jnp.maximum(jnp.dot(xb, w1f, precision=hi) + b1, 0.0)
    if bf16:
        h1 = h1.astype(jnp.bfloat16).astype(jnp.float32)
    h2 = jnp.maximum(jnp.dot(h1, w2f, precision=hi) + b2, 0.0)
    return jnp.dot(h2, w3, precision=hi) + b3


if __name__ == "__main__":
    key = jax.random.PRNGKey(0)
    (k_emb, k_ids, k_ids2, k_w1, k_b1, k_w2, k_b2, k_w3, k_b3) = jax.random.split(key, 9)

    # Deterministic synthetic parameters (shapes from MyModel.__init__).
    emb_table = 0.02 * jax.random.normal(k_emb, (NUM_EMBED, EMBED_DIM), jnp.float32)
    emb_table = emb_table.at[0].set(0.0)  # padding_idx=0 (nn.Embedding init semantics)

    w1 = 0.05 * jax.random.normal(k_w1, (IN_DIM, HIDDEN1), jnp.float32)
    b1 = 0.05 * jax.random.normal(k_b1, (1, HIDDEN1), jnp.float32)
    w2 = 0.05 * jax.random.normal(k_w2, (HIDDEN1, HIDDEN2), jnp.float32)
    b2 = 0.05 * jax.random.normal(k_b2, (1, HIDDEN2), jnp.float32)
    w3 = 0.05 * jax.random.normal(k_w3, (HIDDEN2, OUT), jnp.float32)
    b3 = 0.05 * jax.random.normal(k_b3, (1, OUT), jnp.float32)

    # ---- Case 1: small batch (single grid step).
    B = 8
    ids = jax.random.randint(k_ids, (B, NUM_FEATURES, SEQ_LEN), 0, NUM_EMBED, dtype=jnp.int32)
    out = jax.block_until_ready(my_model_forward(ids, emb_table, w1, b1, w2, b2, w3, b3))
    assert out.shape == (B, OUT)

    ref_bf16 = _reference(ids, emb_table, w1, b1, w2, b2, w3, b3, bf16=True)
    assert jnp.allclose(out, ref_bf16, atol=1e-3, rtol=1e-3)

    # Full-precision reference (original PyTorch forward semantics), loose check
    # to confirm bf16 casting did not change the math materially.
    ref_f32 = _reference(ids, emb_table, w1, b1, w2, b2, w3, b3, bf16=False)
    assert jnp.allclose(out, ref_f32, atol=2e-2, rtol=5e-2)

    # ---- Case 2: multi-tile grid + batch padding (exercises tiling / megacore path).
    B2 = 40
    ids2 = jax.random.randint(k_ids2, (B2, NUM_FEATURES, SEQ_LEN), 0, NUM_EMBED, dtype=jnp.int32)
    out2 = jax.block_until_ready(
        my_model_forward(ids2, emb_table, w1, b1, w2, b2, w3, b3, batch_tile=16))
    assert out2.shape == (B2, OUT)
    ref2 = _reference(ids2, emb_table, w1, b1, w2, b2, w3, b3, bf16=True)
    assert jnp.allclose(out2, ref2, atol=1e-3, rtol=1e-3)

    print("KERNEL_OK")
</pallas_src>

<mosaic_0001>
module attributes {stable_mosaic.version = 11 : i64} {
  func.func @din_mlp_kernel(%arg0: i32, %arg1: memref<8x112xbf16, #tpu.memory_space<vmem>>, %arg2: memref<112x512xbf16, #tpu.memory_space<vmem>>, %arg3: memref<1x512xf32, #tpu.memory_space<vmem>>, %arg4: memref<512x128xbf16, #tpu.memory_space<vmem>>, %arg5: memref<1x128xf32, #tpu.memory_space<vmem>>, %arg6: memref<1x128xf32, #tpu.memory_space<vmem>>, %arg7: memref<1x1xf32, #tpu.memory_space<vmem>>, %arg8: memref<8x1xf32, #tpu.memory_space<vmem>>) attributes {dimension_semantics = [#tpu.dimension_semantics<parallel>], iteration_bounds = array<i64: 1>, scalar_prefetch = 0 : i64, scratch_operands = 0 : i64, tpu.core_type = #tpu.core_type<tc>, window_params = [{transform_indices = @transform_0, window_bounds = array<i64: 8, 112>}, {pipeline_mode = #tpu.pipeline_mode<synchronous>, transform_indices = @transform_1, window_bounds = array<i64: 112, 512>}, {pipeline_mode = #tpu.pipeline_mode<synchronous>, transform_indices = @transform_2, window_bounds = array<i64: 1, 512>}, {pipeline_mode = #tpu.pipeline_mode<synchronous>, transform_indices = @transform_3, window_bounds = array<i64: 512, 128>}, {pipeline_mode = #tpu.pipeline_mode<synchronous>, transform_indices = @transform_4, window_bounds = array<i64: 1, 128>}, {pipeline_mode = #tpu.pipeline_mode<synchronous>, transform_indices = @transform_5, window_bounds = array<i64: 1, 128>}, {pipeline_mode = #tpu.pipeline_mode<synchronous>, transform_indices = @transform_6, window_bounds = array<i64: 1, 1>}, {transform_indices = @transform_7, window_bounds = array<i64: 8, 1>}]} {
    %c0 = arith.constant 0 : index
    %c0_0 = arith.constant 0 : index
    %0 = vector.load %arg1[%c0, %c0_0] : memref<8x112xbf16, #tpu.memory_space<vmem>>, vector<8x112xbf16>
    %c0_1 = arith.constant 0 : index
    %c0_2 = arith.constant 0 : index
    %1 = vector.load %arg2[%c0_1, %c0_2] : memref<112x512xbf16, #tpu.memory_space<vmem>>, vector<112x512xbf16>
    %cst = arith.constant dense<0.000000e+00> : vector<8x512xf32>
    %2 = tpu.matmul %0, %1, %cst {dimension_numbers = #tpu.dot_dimension_numbers<[1], [0], [0], [1], [0, 0, 1, 1], [], []>} : vector<8x112xbf16>, vector<112x512xbf16>, vector<8x512xf32> -> vector<8x512xf32>
    %c0_3 = arith.constant 0 : index
    %c0_4 = arith.constant 0 : index
    %3 = vector.load %arg3[%c0_3, %c0_4] : memref<1x512xf32, #tpu.memory_space<vmem>>, vector<1x512xf32>
    %4 = vector.broadcast %3 : vector<1x512xf32> to vector<8x512xf32>
    %5 = arith.addf %2, %4 : vector<8x512xf32>
    %cst_5 = arith.constant 0.000000e+00 : f32
    %6 = vector.broadcast %cst_5 : f32 to vector<8x512xf32>
    %7 = arith.maximumf %5, %6 : vector<8x512xf32>
    %8 = arith.truncf %7 : vector<8x512xf32> to vector<8x512xbf16>
    %c0_6 = arith.constant 0 : index
    %c0_7 = arith.constant 0 : index
    %9 = vector.load %arg4[%c0_6, %c0_7] : memref<512x128xbf16, #tpu.memory_space<vmem>>, vector<512x128xbf16>
    %cst_8 = arith.constant dense<0.000000e+00> : vector<8x128xf32>
    %10 = tpu.matmul %8, %9, %cst_8 {dimension_numbers = #tpu.dot_dimension_numbers<[1], [0], [0], [1], [0, 0, 1, 1], [], []>} : vector<8x512xbf16>, vector<512x128xbf16>, vector<8x128xf32> -> vector<8x128xf32>
    %c0_9 = arith.constant 0 : index
    %c0_10 = arith.constant 0 : index
    %11 = vector.load %arg5[%c0_9, %c0_10] : memref<1x128xf32, #tpu.memory_space<vmem>>, vector<1x128xf32>
    %12 = vector.broadcast %11 : vector<1x128xf32> to vector<8x128xf32>
    %13 = arith.addf %10, %12 : vector<8x128xf32>
    %cst_11 = arith.constant 0.000000e+00 : f32
    %14 = vector.broadcast %cst_11 : f32 to vector<8x128xf32>
    %15 = arith.maximumf %13, %14 : vector<8x128xf32>
    %c0_12 = arith.constant 0 : index
    %c0_13 = arith.constant 0 : index
    %16 = vector.load %arg6[%c0_12, %c0_13] : memref<1x128xf32, #tpu.memory_space<vmem>>, vector<1x128xf32>
    %17 = vector.broadcast %16 : vector<1x128xf32> to vector<8x128xf32>
    %18 = arith.mulf %15, %17 : vector<8x128xf32>
    %cst_14 = arith.constant dense<0.000000e+00> : vector<8xf32>
    %19 = vector.multi_reduction <add>, %18, %cst_14 [1] : vector<8x128xf32> to vector<8xf32>
    %20 = vector.shape_cast %19 : vector<8xf32> to vector<8x1xf32>
    %c0_15 = arith.constant 0 : index
    %c0_16 = arith.constant 0 : index
    %21 = vector.load %arg7[%c0_15, %c0_16] : memref<1x1xf32, #tpu.memory_space<vmem>>, vector<1x1xf32>
    %22 = vector.broadcast %21 : vector<1x1xf32> to vector<8x1xf32>
    %23 = arith.addf %20, %22 : vector<8x1xf32>
    %c0_17 = arith.constant 0 : index
    %c0_18 = arith.constant 0 : index
    %24 = vector.load %arg8[%c0_17, %c0_18] : memref<8x1xf32, #tpu.memory_space<vmem>>, vector<8x1xf32>
    tpu.vector_store %arg8[%c0_17, %c0_18], %23 {strides = array<i32>} : memref<8x1xf32, #tpu.memory_space<vmem>>, vector<8x1xf32>,
    return
  }
  func.func @transform_0(%arg0: i32) -> (i32, i32) {
    %c0_i32 = arith.constant 0 : i32
    %c0_i32_0 = arith.constant 0 : i32
    return %arg0, %c0_i32 : i32, i32
  }
  func.func @transform_1(%arg0: i32) -> (i32, i32) {
    %c0_i32 = arith.constant 0 : i32
    %c0_i32_0 = arith.constant 0 : i32
    %c0_i32_1 = arith.constant 0 : i32
    return %c0_i32, %c0_i32_0 : i32, i32
  }
  func.func @transform_2(%arg0: i32) -> (i32, i32) {
    %c0_i32 = arith.constant 0 : i32
    %c0_i32_0 = arith.constant 0 : i32
    %c0_i32_1 = arith.constant 0 : i32
    return %c0_i32, %c0_i32_0 : i32, i32
  }
  func.func @transform_3(%arg0: i32) -> (i32, i32) {
    %c0_i32 = arith.constant 0 : i32
    %c0_i32_0 = arith.constant 0 : i32
    %c0_i32_1 = arith.constant 0 : i32
    return %c0_i32, %c0_i32_0 : i32, i32
  }
  func.func @transform_4(%arg0: i32) -> (i32, i32) {
    %c0_i32 = arith.constant 0 : i32
    %c0_i32_0 = arith.constant 0 : i32
    %c0_i32_1 = arith.constant 0 : i32
    return %c0_i32, %c0_i32_0 : i32, i32
  }
  func.func @transform_5(%arg0: i32) -> (i32, i32) {
    %c0_i32 = arith.constant 0 : i32
    %c0_i32_0 = arith.constant 0 : i32
    %c0_i32_1 = arith.constant 0 : i32
    return %c0_i32, %c0_i32_0 : i32, i32
  }
  func.func @transform_6(%arg0: i32) -> (i32, i32) {
    %c0_i32 = arith.constant 0 : i32
    %c0_i32_0 = arith.constant 0 : i32
    %c0_i32_1 = arith.constant 0 : i32
    return %c0_i32, %c0_i32_0 : i32, i32
  }
  func.func @transform_7(%arg0: i32) -> (i32, i32) {
    %c0_i32 = arith.constant 0 : i32
    %c0_i32_0 = arith.constant 0 : i32
    return %arg0, %c0_i32 : i32, i32
  }
}

</mosaic_0001>

<bundles_post_ra>
// kernel: my_model_forward.1
= control target key start
LH: loop header
LB: loop body
LE: loop exit
PB: predicated region body
PF: predicated region fallthrough
CT: control target
= control target key end

     0   :  { %v866_v1 = vmov 0   ;;  %vm220_vm0 = vcmask 916480   ;;  %v60_v62 = vlaneseq  ;;  %vm676_vm1 = vcmask 7168   ;;  %s1105_s1 = inlined_call_operand.vmem [shape: bf16[112,512], index: 1, kind: input, shape index: {}]   ;;  %s1106_s3 = inlined_call_operand.vmem [shape: bf16[512,128], index: 3, kind: input, shape index: {}]   ;;  %s1107_s0 = inlined_call_operand.vmem [shape: bf16[8,112], index: 0, kind: input, shape index: {}]   ;;  %s1108_s2 = inlined_call_operand.vmem [shape: f32[1,512], index: 2, kind: input, shape index: {}]   ;;  %s1109_s6 = inlined_call_operand.<no memory space> [shape: f32[1,1], index: 6, kind: input, shape index: {}]   ;;  %s1110_s4 = inlined_call_operand.vmem [shape: f32[1,128], index: 4, kind: input, shape index: {}]   ;;  %s1111_s5 = inlined_call_operand.vmem [shape: f32[1,128], index: 5, kind: input, shape index: {}]   ;;  %s1112_s7 = inlined_call_operand.vmem [shape: f32[8,1], index: 7, kind: output, shape index: {}]  }
   0x1   :  { %v792_v0 = vld [vmem:[%s1105_s1 + $0xc4] ss:$16 sps:$4 sm:$0xff]   ;;  %256 = vmatprep.mubr.bf16.mxu0 %v866_v1  ;;  %297 = vmatprep.mubr.bf16.mxu1 %v866_v1  ;;  %v794_v2 = vld [vmem:[%s1105_s1 + $0xcc] ss:$16 sps:$4 sm:$0xff]   ;;  %v796_v3 = vld [vmem:[%s1105_s1 + $0xc0] ss:$16 sps:$4 sm:$0xff]  }
   0x2   :  { %226 = vmatprep.subr.bf16.mxu0 %v792_v0  ;;  %v797_v4 = vld [vmem:[%s1105_s1 + $0xc8] ss:$16 sps:$4 sm:$0xff]   ;;  %267 = vmatprep.subr.bf16.mxu1 %v794_v2  ;;  %v798_v5 = vld [vmem:[%s1105_s1 + $0xa4] ss:$16 sps:$4 sm:$0xff]   ;;  %v800_v6 = vld [vmem:[%s1105_s1 + $0xac] ss:$16 sps:$4 sm:$0xff]  }
   0x3   :  { %227 = vmatpush1.bf16.msra.mxu0 %v796_v3  ;;  %268 = vmatpush1.bf16.msra.mxu1 %v797_v4  ;;  %v802_v7 = vld [vmem:[%s1105_s1 + $0xa0] ss:$16 sps:$4 sm:$0xff]   ;;  %v803_v8 = vld [vmem:[%s1105_s1 + $0xa8] ss:$16 sps:$4 sm:$0xff]   ;;  %v804_v9 = vld [vmem:[%s1105_s1 + $0x84] ss:$16 sps:$4 sm:$0xff]  }
   0x4   :  { %228 = vmatprep.subr.bf16.mxu0 %v798_v5  ;;  %269 = vmatprep.subr.bf16.mxu1 %v800_v6  ;;  %v806_v10 = vld [vmem:[%s1105_s1 + $0x8c] ss:$16 sps:$4 sm:$0xff]   ;;  %v808_v11 = vld [vmem:[%s1105_s1 + $0x80] ss:$16 sps:$4 sm:$0xff]   ;;  %v809_v12 = vld [vmem:[%s1105_s1 + $0x88] ss:$16 sps:$4 sm:$0xff]  }
   0x5   :  { %v810_v13 = vld [vmem:[%s1105_s1 + $0x64] ss:$16 sps:$4 sm:$0xff]   ;;  %v812_v14 = vld [vmem:[%s1105_s1 + $0x6c] ss:$16 sps:$4 sm:$0xff]   ;;  %v814_v15 = vld [vmem:[%s1105_s1 + $0x60] ss:$16 sps:$4 sm:$0xff]  }
   0x6   :  { %v815_v16 = vld [vmem:[%s1105_s1 + $0x68] ss:$16 sps:$4 sm:$0xff]   ;;  %v816_v17 = vld [vmem:[%s1105_s1 + $0x44] ss:$16 sps:$4 sm:$0xff]   ;;  %v818_v18 = vld [vmem:[%s1105_s1 + $0x4c] ss:$16 sps:$4 sm:$0xff]  }
   0x7   :  { %229 = vmatpush1.bf16.msra.mxu0 %v802_v7  ;;  %270 = vmatpush1.bf16.msra.mxu1 %v803_v8  ;;  %v820_v19 = vld [vmem:[%s1105_s1 + $0x40] ss:$16 sps:$4 sm:$0xff]   ;;  %v821_v20 = vld [vmem:[%s1105_s1 + $0x48] ss:$16 sps:$4 sm:$0xff]   ;;  %v822_v21 = vld [vmem:[%s1105_s1 + $0x24] ss:$16 sps:$4 sm:$0xff]  }
   0x8   :  { %230 = vmatprep.subr.bf16.mxu0 %v804_v9  ;;  %271 = vmatprep.subr.bf16.mxu1 %v806_v10  ;;  %v824_v22 = vld [vmem:[%s1105_s1 + $0x2c] ss:$16 sps:$4 sm:$0xff]   ;;  %v826_v23 = vld [vmem:[%s1105_s1 + $0x20] ss:$16 sps:$4 sm:$0xff]   ;;  %v827_v24 = vld [vmem:[%s1105_s1 + $0x28] ss:$16 sps:$4 sm:$0xff]  }
   0x9   :  { %v828_v25 = vld [vmem:[%s1105_s1 + $0x4] ss:$16 sps:$4 sm:$0xff]   ;;  %v830_v26 = vld [vmem:[%s1105_s1 + $0xc] ss:$16 sps:$4 sm:$0xff]   ;;  %v832_v27 = vld [vmem:[%s1105_s1] ss:$16 sps:$4 sm:$0xff]  }
   0xa   :  { %v833_v28 = vld [vmem:[%s1105_s1 + $0x8] ss:$16 sps:$4 sm:$0xff]   ;;  %v29_v31 = vld [vmem:[%s1107_s0] sm:$0xf]  ;;  %v838_v34 = vld [vmem:[%s1106_s3 + $0x70] sm:$0xff]   ;;  %v61_v63 = vshrl.u32 %v60_v62, 7 }
   0xb   :  { %231 = vmatpush1.bf16.msra.mxu0 %v808_v11  ;;  %272 = vmatpush1.bf16.msra.mxu1 %v809_v12  ;;  %v834_v29 = vld [vmem:[%s1106_s3 + $0x78] sm:$0xff]   ;;  %v839_v35 = vld [vmem:[%s1106_s3 + $0xf0] sm:$0xff]   ;;  %v842_v38 = vld [vmem:[%s1106_s3 + $0x68] sm:$0xff]  }
   0xc   :  { %232 = vmatprep.subr.bf16.mxu0 %v810_v13  ;;  %273 = vmatprep.subr.bf16.mxu1 %v812_v14  ;;  %v835_v30 = vld [vmem:[%s1106_s3 + $0xf8] sm:$0xff]   ;;  %v840_v36 = vld [vmem:[%s1106_s3 + $0x30] sm:$0xff]   ;;  %v843_v39 = vld [vmem:[%s1106_s3 + $0xe8] sm:$0xff]   ;;  %v62_v0 = vsub.s32 0, %v61_v63  ;;  %v70_v1 = vsub.s32 2, %v61_v63  ;;  %v66_v3 = vsub.s32 1, %v61_v63 }
   0xd   :  { %v836_v32 = vld [vmem:[%s1106_s3 + $0x38] sm:$0xff]   ;;  %v841_v37 = vld [vmem:[%s1106_s3 + $0xb0] sm:$0xff]   ;;  %v844_v40 = vld [vmem:[%s1106_s3 + $0x28] sm:$0xff]   ;;  %v74_v4 = vsub.s32 3, %v61_v63 }
   0xe   :  { %v837_v33 = vld [vmem:[%s1106_s3 + $0xb8] sm:$0xff]   ;;  %v845_v41 = vld [vmem:[%s1106_s3 + $0xa8] sm:$0xff]   ;;  %v846_v42 = vld [vmem:[%s1106_s3 + $0x60] sm:$0xff]  }
   0xf   :  { %233 = vmatpush1.bf16.msra.mxu0 %v814_v15  ;;  %274 = vmatpush1.bf16.msra.mxu1 %v815_v16  ;;  %v847_v43 = vld [vmem:[%s1106_s3 + $0xe0] sm:$0xff]   ;;  %v850_v46 = vld [vmem:[%s1106_s3 + $0x58] sm:$0xff]   ;;  %v854_v50 = vld [vmem:[%s1106_s3 + $0x50] sm:$0xff]  }
  0x10   :  { %234 = vmatprep.subr.bf16.mxu0 %v816_v17  ;;  %275 = vmatprep.subr.bf16.mxu1 %v818_v18  ;;  %v848_v44 = vld [vmem:[%s1106_s3 + $0x20] sm:$0xff]   ;;  %v851_v47 = vld [vmem:[%s1106_s3 + $0xd8] sm:$0xff]   ;;  %v855_v51 = vld [vmem:[%s1106_s3 + $0xd0] sm:$0xff]  }
  0x11   :  { %v849_v45 = vld [vmem:[%s1106_s3 + $0xa0] sm:$0xff]   ;;  %v852_v48 = vld [vmem:[%s1106_s3 + $0x18] sm:$0xff]   ;;  %v856_v52 = vld [vmem:[%s1106_s3 + $0x10] sm:$0xff]  }
  0x12   :  { %v853_v49 = vld [vmem:[%s1106_s3 + $0x98] sm:$0xff]   ;;  %v857_v53 = vld [vmem:[%s1106_s3 + $0x90] sm:$0xff]   ;;  %v858_v54 = vld [vmem:[%s1106_s3 + $0x48] sm:$0xff]  }
  0x13   :  { %235 = vmatpush1.bf16.msra.mxu0 %v820_v19  ;;  %276 = vmatpush1.bf16.msra.mxu1 %v821_v20  ;;  %v859_v55 = vld [vmem:[%s1106_s3 + $0xc8] sm:$0xff]   ;;  %v862_v58 = vld [vmem:[%s1106_s3 + $0x40] sm:$0xff]  }
  0x14   :  { %236 = vmatprep.subr.bf16.mxu0 %v822_v21  ;;  %277 = vmatprep.subr.bf16.mxu1 %v824_v22  ;;  %v860_v56 = vld [vmem:[%s1106_s3 + $0x8] sm:$0xff]   ;;  %v863_v59 = vld [vmem:[%s1106_s3 + $0xc0] sm:$0xff]  }
  0x15   :  { %v861_v57 = vld [vmem:[%s1106_s3 + $0x88] sm:$0xff]   ;;  %v864_v60 = vld [vmem:[%s1106_s3] sm:$0xff]  }
  0x16   :  { %v865_v61 = vld [vmem:[%s1106_s3 + $0x80] sm:$0xff]  }
  0x17   :  { %237 = vmatpush1.bf16.msra.mxu0 %v826_v23  ;;  %278 = vmatpush1.bf16.msra.mxu1 %v827_v24  ;;  %v58_v2 = vld [vmem:[%s1108_s2] sm:$0xf] }
  0x18   :  { %238 = vmatprep.subr.bf16.mxu0 %v828_v25  ;;  %279 = vmatprep.subr.bf16.mxu1 %v830_v26  ;;  %v63_v5 = vrot.slane %v58_v2, %v62_v0  ;;  %v71_v6 = vrot.slane %v58_v2, %v70_v1  ;;  %v67_v7 = vrot.slane %v58_v2, %v66_v3 }
  0x19   :  { %v75_v8 = vrot.slane %v58_v2, %v74_v4 }
  0x1b   :  { %239 = vmatpush1.bf16.msra.mxu0 %v832_v27  ;;  %280 = vmatpush1.bf16.msra.mxu1 %v833_v28 }
  0x1c   :  { %747 = vmatprep.subr.bf16.mxu0 %v834_v29  ;;  %769 = vmatprep.subr.bf16.mxu1 %v835_v30  ;;  %v12_v29 = vstv %s1109_s6 }
  0x1d   :  { %13 = vst [vmem:[#allocation2] sm:$0x1] %v12_v29 }
  0x1e   :  { %710 = vmatmul.mubr.msk.bf16.vlgmr.msra.gmra.mxu0 %vm220_vm0, %v29_v31  ;;  %711 = vmatmul.mubr.msk.bf16.vlgmr.msra.gmra.mxu1 %vm220_vm0, %v29_v31 }
  0x1f   :  { %748 = vmatpush3.bf16.msra.mxu0 %v836_v32  ;;  %770 = vmatpush3.bf16.msra.mxu1 %v837_v33  ;;  %v712_v32 = vld [vmem:[%s1110_s4] ss:$0 sm:$0xff] }
  0x20   :  { %749 = vmatprep.subr.bf16.mxu0 %v838_v34  ;;  %771 = vmatprep.subr.bf16.mxu1 %v839_v35 }
  0x23   :  { %750 = vmatpush3.bf16.msra.mxu0 %v840_v36  ;;  %772 = vmatpush3.bf16.msra.mxu1 %v841_v37 }
  0x24   :  { %751 = vmatprep.subr.bf16.mxu0 %v842_v38  ;;  %773 = vmatprep.subr.bf16.mxu1 %v843_v39 }
  0x27   :  { %752 = vmatpush3.bf16.msra.mxu0 %v844_v40  ;;  %774 = vmatpush3.bf16.msra.mxu1 %v845_v41 }
  0x28   :  { %753 = vmatprep.subr.bf16.mxu0 %v846_v42  ;;  %775 = vmatprep.subr.bf16.mxu1 %v847_v43  ;;  %v745_v43 = vld [vmem:[%s1111_s5] ss:$0 sm:$0xff] }
  0x2b   :  { %754 = vmatpush3.bf16.msra.mxu0 %v848_v44  ;;  %776 = vmatpush3.bf16.msra.mxu1 %v849_v45 }
  0x2c   :  { %755 = vmatprep.subr.bf16.mxu0 %v850_v46  ;;  %777 = vmatprep.subr.bf16.mxu1 %v851_v47  ;;  %v746_v46 = vld [vmem:[#allocation2] ss:$0 sm:$0xff] }
  0x2f   :  { %756 = vmatpush3.bf16.msra.mxu0 %v852_v48  ;;  %778 = vmatpush3.bf16.msra.mxu1 %v853_v49 }
  0x30   :  { %757 = vmatprep.subr.bf16.mxu0 %v854_v50  ;;  %779 = vmatprep.subr.bf16.mxu1 %v855_v51 }
  0x33   :  { %758 = vmatpush3.bf16.msra.mxu0 %v856_v52  ;;  %780 = vmatpush3.bf16.msra.mxu1 %v857_v53 }
  0x34   :  { %759 = vmatprep.subr.bf16.mxu0 %v858_v54  ;;  %781 = vmatprep.subr.bf16.mxu1 %v859_v55 }
  0x37   :  { %760 = vmatpush3.bf16.msra.mxu0 %v860_v56  ;;  %782 = vmatpush3.bf16.msra.mxu1 %v861_v57 }
  0x38   :  { %761 = vmatprep.subr.bf16.mxu0 %v862_v58  ;;  %783 = vmatprep.subr.bf16.mxu1 %v863_v59 }
  0x3b   :  { %762 = vmatpush3.bf16.msra.mxu0 %v864_v60  ;;  %784 = vmatpush3.bf16.msra.mxu1 %v865_v61 }
  0xde   :  { %v258_v9 = vpop.f32.mrf.mxu0  ;;  %v299_v10 = vpop.f32.mrf.mxu1 }
  0xdf   :  { %v259_v11 = vadd.f32 %v258_v9, %v63_v5  ;;  %v300_v12 = vadd.f32 %v299_v10, %v71_v6 }
  0xe0   :  { %v260_v13 = vpop.f32.mrf.mxu0  ;;  %v301_v14 = vpop.f32.mrf.mxu1 }
  0xe1   :  { %v308_v15 = vmax.f32 %v300_v12, 0.0  ;;  %v261_v16 = vadd.f32 %v260_v13, %v67_v7  ;;  %v302_v17 = vadd.f32 %v301_v14, %v75_v8  ;;  %v306_v18 = vmax.f32 %v259_v11, 0.0 }
  0xe2   :  { %v262_v19 = vpop.f32.mrf.mxu0  ;;  %v303_v20 = vpop.f32.mrf.mxu1 }
  0xe3   :  { %v307_v21 = vmax.f32 %v261_v16, 0.0  ;;  %v309_v22 = vmax.f32 %v302_v17, 0.0  ;;  %v312_v23 = vpack.c.bf16 %v308_v15, %v308_v15  ;;  %v310_v28 = vpack.c.bf16 %v306_v18, %v306_v18 }
  0xe4   :  { %v263_v24 = vpop.f32.mrf.mxu0  ;;  %v304_v25 = vpop.f32.mrf.mxu1 }
  0xe5   :  { %v311_v26 = vpack.c.bf16 %v307_v21, %v307_v21  ;;  %v313_v27 = vpack.c.bf16 %v309_v22, %v309_v22 }
  0xe7   :  { %609 = vmatprep.mubr.bf16.mxu0 %v311_v26  ;;  %649 = vmatprep.mubr.bf16.mxu1 %v313_v27 }
  0xe8   :  { %610 = vmatmul.mubr.bf16.vlgmr.msra.gmra.mxu0 %v310_v28  ;;  %650 = vmatmul.mubr.bf16.vlgmr.msra.gmra.mxu1 %v312_v23 }
 0x1a8   :  { %v763_v30 = vpop.f32.mrf.mxu0  ;;  %v785_v31 = vpop.f32.mrf.mxu1 }
 0x1aa   :  { %v764_v33 = vpop.f32.mrf.mxu0  ;;  %v786_v34 = vpop.f32.mrf.mxu1 }
 0x1ab   :  { %v765_v35 = vadd.f32 %v764_v33, %v763_v30  ;;  %v787_v39 = vadd.f32 %v786_v34, %v785_v31 }
 0x1ac   :  { %v766_v36 = vpop.f32.mrf.mxu0  ;;  %v788_v37 = vpop.f32.mrf.mxu1 }
 0x1ad   :  { %v612_v38 = vadd.f32 %v765_v35, %v712_v32 }
 0x1ae   :  { %v767_v40 = vpop.f32.mrf.mxu0  ;;  %v789_v41 = vpop.f32.mrf.mxu1 }
 0x1af   :  { %v652_v42 = vadd.f32 %v787_v39, %v612_v38 }
 0x1b1   :  { %v657_v44 = vmax.f32 %v652_v42, 0.0 }
 0x1b3   :  { %v665_v45 = vmul.f32 %v745_v43, %v657_v44 }
 0x1b5   :  { %666 = vadd.xlane.f32.xlu0 %v665_v45 }
 0x23e   :  { %v667_v47 = vpop.xlane.xlu0 %666 }
 0x23f   :  { %v675_v48 = vadd.f32 %v746_v46, %v667_v47 }
 0x241   :  { %677 = vst.msk [vmem:[%s1112_s7] sm:$0xff] %vm676_vm1, %v675_v48 }

</bundles_post_ra>
